<compile_context>
chip_gen: v6e
topology: v6e:2x2x1
jax: 0.10.0
libtpu: 0.0.40
codegen_flags: <defaults>
</compile_context>

<pallas_src>
import jax
import jax.numpy as jnp
from jax.experimental import pallas as pl
from jax.experimental.pallas import tpu as pltpu


def _round_up(x, m):
    return ((x + m - 1) // m) * m


# ---------------------------------------------------------------------------
# Weight-resident path: 1-D grid over M, whole (K, N) weight lives in VMEM.
# ---------------------------------------------------------------------------
def _linear_resident_kernel(x_ref, w_ref, b_ref, o_ref):
    # x_ref: [tm, K] native dtype, w_ref: [K, N] bf16 (resident),
    # b_ref: [1, N] f32 (resident), o_ref: [tm, N] out dtype.
    acc = jnp.dot(
        x_ref[...].astype(w_ref.dtype), w_ref[...],
        preferred_element_type=jnp.float32,
    )
    o_ref[...] = (acc + b_ref[...]).astype(o_ref.dtype)


def _resident_tm(M, K, N, x_itemsize, out_itemsize, w_bytes):
    """Pick the M tile for the weight-resident path (VMEM-budget aware)."""
    budget = (44 << 20) - 2 * w_bytes                 # weight may double-buffer
    per_row = 2 * (K * x_itemsize + N * out_itemsize)  # x & out, double-buffered
    cap = max(8, budget // per_row)

    if M <= cap:
        tm = _round_up(M, 8)
    else:
        tm = min(512, int(cap))
        if tm >= 256:
            tm = (tm // 256) * 256   # fill the 256-wide MXU (v6e/v7x)
        else:
            tm = max(8, (tm // 8) * 8)

    # v7x megacore: keep at least 2 blocks along the parallel M axis whenever
    # there is enough work, so both TensorCores get a share.
    if M > 256 and pl.cdiv(M, tm) < 2:
        tm = _round_up(pl.cdiv(M, 2), 8)
    return max(8, tm)


def _pallas_linear_resident(x2d, w_c, b2d, out_dtype):
    M, K = x2d.shape
    N = w_c.shape[1]
    w_bytes = K * N * jnp.dtype(w_c.dtype).itemsize
    tm = _resident_tm(M, K, N,
                      jnp.dtype(x2d.dtype).itemsize,
                      jnp.dtype(out_dtype).itemsize,
                      w_bytes)

    return pl.pallas_call(
        _linear_resident_kernel,
        out_shape=jax.ShapeDtypeStruct((M, N), out_dtype),
        grid_spec=pltpu.PrefetchScalarGridSpec(
            num_scalar_prefetch=0,
            grid=(pl.cdiv(M, tm),),
            in_specs=[
                pl.BlockSpec((tm, K), lambda i: (i, 0)),   # x: streamed over M
                pl.BlockSpec((K, N), lambda i: (0, 0)),    # W: resident
                pl.BlockSpec((1, N), lambda i: (0, 0)),    # b: resident
            ],
            out_specs=pl.BlockSpec((tm, N), lambda i: (i, 0)),
        ),
        compiler_params=pltpu.CompilerParams(
            dimension_semantics=("parallel",),
            vmem_limit_bytes=48 << 20,
        ),
    )(x2d, w_c, b2d)


# ---------------------------------------------------------------------------
# Tiled fallback path: 3-D (M, N, K) grid for weights too big to stay resident.
# ---------------------------------------------------------------------------
def _linear_tiled_kernel(x_ref, w_ref, b_ref, o_ref, acc_ref):
    # x_ref: [tm, tk] native, w_ref: [tk, tn] bf16, b_ref: [1, tn] f32,
    # o_ref: [tm, tn] out dtype, acc_ref: [tm, tn] f32 (K-resident).
    k = pl.program_id(2)

    @pl.when(k == 0)
    def _init():
        acc_ref[...] = jnp.zeros_like(acc_ref)

    acc_ref[...] += jnp.dot(
        x_ref[...].astype(w_ref.dtype), w_ref[...],
        preferred_element_type=jnp.float32,
    )

    @pl.when(k == pl.num_programs(2) - 1)
    def _finalize():
        # Bias added exactly once per output tile, in f32 on the accumulator.
        o_ref[...] = (acc_ref[...] + b_ref[...]).astype(o_ref.dtype)


def _pick_tk(K):
    # Prefer a tk that exactly divides K so no K-padding copy is needed.
    for cand in (2048, 1024, 512, 256, 128):
        if K % cand == 0:
            return cand
    return 512


def _pallas_linear_tiled(x2d, w_c, b2d, out_dtype):
    M, K = x2d.shape
    N = w_c.shape[1]

    tm = min(512, _round_up(M, 8))
    if tm >= 256:
        tm = (tm // 256) * 256
    tn = min(512, _round_up(N, 128))
    tk = _pick_tk(K)

    # Zero-pad along K only (required for reduction correctness). M/N edges are
    # handled by partial blocks; padded rows/cols never reach valid outputs.
    Kp = _round_up(K, tk)
    if Kp != K:
        # NOTE: materializes one extra copy of x; only hit when K is not a
        # multiple of 128-aligned tile sizes AND the weight exceeds VMEM.
        x2d = jnp.pad(x2d, ((0, 0), (0, Kp - K)))
        w_c = jnp.pad(w_c, ((0, Kp - K), (0, 0)))

    grid = (pl.cdiv(M, tm), pl.cdiv(N, tn), Kp // tk)

    return pl.pallas_call(
        _linear_tiled_kernel,
        out_shape=jax.ShapeDtypeStruct((M, N), out_dtype),
        grid_spec=pltpu.PrefetchScalarGridSpec(
            num_scalar_prefetch=0,
            grid=grid,
            in_specs=[
                pl.BlockSpec((tm, tk), lambda i, j, k: (i, k)),
                pl.BlockSpec((tk, tn), lambda i, j, k: (k, j)),
                pl.BlockSpec((1, tn), lambda i, j, k: (0, j)),
            ],
            out_specs=pl.BlockSpec((tm, tn), lambda i, j, k: (i, j)),
            scratch_shapes=[pltpu.VMEM((tm, tn), jnp.float32)],
        ),
        compiler_params=pltpu.CompilerParams(
            dimension_semantics=("parallel", "parallel", "arbitrary"),
            vmem_limit_bytes=48 << 20,
        ),
    )(x2d, w_c, b2d)


def _pallas_linear(x2d, weight, bias, out_dtype, compute_dtype):
    M, K = x2d.shape
    N = weight.shape[1]

    # Weight gets a one-time bf16 cast (it is read exactly once from HBM); the
    # activation stays in its native dtype and is cast per-tile in the kernel.
    w_c = weight.astype(compute_dtype)
    b2d = bias.reshape(1, N).astype(jnp.float32)

    w_bytes = K * N * jnp.dtype(compute_dtype).itemsize
    if 2 * w_bytes <= (24 << 20):       # resident (double-buffered) weight fits
        return _pallas_linear_resident(x2d, w_c, b2d, out_dtype)
    return _pallas_linear_tiled(x2d, w_c, b2d, out_dtype)


def wrapnode_forward(features, lens, weight, bias, *,
                     compute_dtype=jnp.bfloat16, use_pallas=None):
    """WrapNode.forward: returns (output, lens_o).

    features: [B, T, idim]
    lens:     [B] int32 (passed through unchanged)
    weight:   [idim, odim]
    bias:     [odim]
    """
    B, T, idim = features.shape
    odim = weight.shape[1]
    M = B * T

    if use_pallas is None:
        # Tiny problems: pallas_call launch + per-step overhead dominates;
        # let XLA fuse them instead (threshold ~128 MFLOP).
        use_pallas = (2 * M * idim * odim) >= (1 << 27)

    x2d = features.reshape(M, idim)
    if use_pallas:
        out2d = _pallas_linear(x2d, weight, bias, features.dtype, compute_dtype)
    else:
        out2d = (
            jnp.dot(x2d.astype(compute_dtype), weight.astype(compute_dtype),
                    preferred_element_type=jnp.float32)
            + bias.astype(jnp.float32)
        ).astype(features.dtype)

    output = out2d.reshape(B, T, odim)
    lens_o = lens  # WrapNode forwards lens untouched through its single node
    return output, lens_o


if __name__ == "__main__":
    B, T, idim, odim = 2, 8, 32, 32

    key = jax.random.PRNGKey(0)
    k_x, k_w, k_b = jax.random.split(key, 3)

    features = jax.random.normal(k_x, (B, T, idim), dtype=jnp.float32)
    lens = jnp.array([T, T - 2], dtype=jnp.int32)

    # Deterministic parameter init (synthetic, not a checkpoint load).
    weight = jax.random.normal(k_w, (idim, odim), dtype=jnp.float32) * 0.05
    bias = jax.random.normal(k_b, (odim,), dtype=jnp.float32) * 0.01

    # Force the Pallas path so the kernel itself is exercised at test size.
    output, lens_o = wrapnode_forward(features, lens, weight, bias,
                                      use_pallas=True)
    jax.block_until_ready(output)
    jax.block_until_ready(lens_o)

    # Reference (same bf16 operands, f32 accumulation, f32 bias add).
    ref2d = jnp.dot(
        features.reshape(B * T, idim).astype(jnp.bfloat16),
        weight.astype(jnp.bfloat16),
        preferred_element_type=jnp.float32,
    ) + bias
    ref = ref2d.reshape(B, T, odim).astype(features.dtype)

    assert output.shape == (B, T, odim)
    assert lens_o.shape == (B,)
    assert jnp.allclose(output, ref, atol=1e-2, rtol=1e-2), float(
        jnp.max(jnp.abs(output - ref))
    )

    print("KERNEL_OK")
</pallas_src>

<mosaic_0001>
module attributes {stable_mosaic.version = 11 : i64} {
  func.func @_linear_resident_kernel(%arg0: i32, %arg1: memref<16x32xf32, #tpu.memory_space<vmem>>, %arg2: memref<32x32xbf16, #tpu.memory_space<vmem>>, %arg3: memref<1x32xf32, #tpu.memory_space<vmem>>, %arg4: memref<16x32xf32, #tpu.memory_space<vmem>>) attributes {dimension_semantics = [#tpu.dimension_semantics<parallel>], iteration_bounds = array<i64: 1>, scalar_prefetch = 0 : i64, scratch_operands = 0 : i64, tpu.core_type = #tpu.core_type<tc>, window_params = [{transform_indices = @transform_0, window_bounds = array<i64: 16, 32>}, {pipeline_mode = #tpu.pipeline_mode<synchronous>, transform_indices = @transform_1, window_bounds = array<i64: 32, 32>}, {pipeline_mode = #tpu.pipeline_mode<synchronous>, transform_indices = @transform_2, window_bounds = array<i64: 1, 32>}, {transform_indices = @transform_3, window_bounds = array<i64: 16, 32>}]} {
    %c0 = arith.constant 0 : index
    %c0_0 = arith.constant 0 : index
    %0 = vector.load %arg1[%c0, %c0_0] : memref<16x32xf32, #tpu.memory_space<vmem>>, vector<16x32xf32>
    %1 = arith.truncf %0 : vector<16x32xf32> to vector<16x32xbf16>
    %c0_1 = arith.constant 0 : index
    %c0_2 = arith.constant 0 : index
    %2 = vector.load %arg2[%c0_1, %c0_2] : memref<32x32xbf16, #tpu.memory_space<vmem>>, vector<32x32xbf16>
    %cst = arith.constant dense<0.000000e+00> : vector<16x32xf32>
    %3 = tpu.matmul %1, %2, %cst {dimension_numbers = #tpu.dot_dimension_numbers<[1], [0], [0], [1], [0, 0, 1, 1], [], []>} : vector<16x32xbf16>, vector<32x32xbf16>, vector<16x32xf32> -> vector<16x32xf32>
    %c0_3 = arith.constant 0 : index
    %c0_4 = arith.constant 0 : index
    %4 = vector.load %arg3[%c0_3, %c0_4] : memref<1x32xf32, #tpu.memory_space<vmem>>, vector<1x32xf32>
    %5 = vector.broadcast %4 : vector<1x32xf32> to vector<16x32xf32>
    %6 = arith.addf %3, %5 : vector<16x32xf32>
    %c0_5 = arith.constant 0 : index
    %c0_6 = arith.constant 0 : index
    %7 = vector.load %arg4[%c0_5, %c0_6] : memref<16x32xf32, #tpu.memory_space<vmem>>, vector<16x32xf32>
    tpu.vector_store %arg4[%c0_5, %c0_6], %6 {strides = array<i32>} : memref<16x32xf32, #tpu.memory_space<vmem>>, vector<16x32xf32>,
    return
  }
  func.func @transform_0(%arg0: i32) -> (i32, i32) {
    %c0_i32 = arith.constant 0 : i32
    %c0_i32_0 = arith.constant 0 : i32
    return %arg0, %c0_i32 : i32, i32
  }
  func.func @transform_1(%arg0: i32) -> (i32, i32) {
    %c0_i32 = arith.constant 0 : i32
    %c0_i32_0 = arith.constant 0 : i32
    %c0_i32_1 = arith.constant 0 : i32
    return %c0_i32, %c0_i32_0 : i32, i32
  }
  func.func @transform_2(%arg0: i32) -> (i32, i32) {
    %c0_i32 = arith.constant 0 : i32
    %c0_i32_0 = arith.constant 0 : i32
    %c0_i32_1 = arith.constant 0 : i32
    return %c0_i32, %c0_i32_0 : i32, i32
  }
  func.func @transform_3(%arg0: i32) -> (i32, i32) {
    %c0_i32 = arith.constant 0 : i32
    %c0_i32_0 = arith.constant 0 : i32
    return %arg0, %c0_i32 : i32, i32
  }
}

</mosaic_0001>

<bundles_post_ra>
// kernel: tpu_custom_call.1
= control target key start
LH: loop header
LB: loop body
LE: loop exit
PB: predicated region body
PF: predicated region fallthrough
CT: control target
= control target key end

     0   :  { %8 = vsyncpa [#allocation3], 0  ;;  %s274_s0 = inlined_call_operand.hbm [shape: f32[16,32], index: 0, kind: input, shape index: {}]   ;;  %s275_s1 = inlined_call_operand.hbm [shape: bf16[32,32], index: 1, kind: input, shape index: {}]   ;;  %s276_s2 = inlined_call_operand.vmem [shape: f32[1,32], index: 2, kind: input, shape index: {}]   ;;  %s277_s3 = inlined_call_operand.hbm [shape: f32[16,32], index: 3, kind: output, shape index: {}]  }
   0x1   :  { %9 = vsyncpa [#allocation6], 0 }
   0x2   :  { %10 = vsyncpa [#allocation4], 0  ;;  %s227_s12 = smov [#allocation2]  }
   0x3   :  { %s16_s13 = sshll.u32 %s227_s12, 4  ;;  %s17_s13 = int_to_ptr.vmem [resolvable:$true] %s16_s13 }
   0x4   :  { %s169_s14 = scalar_lea.vmem %s17_s13, 256  ;;  %p174_p1 = scmp.lt.s32.totalorder %s17_s13, %s17_s13 }
   0x5   :  { %p170_p0 = scmp.ne.s32.totalorder %s17_s13, %s169_s14  ;;  %p175_p2 = scmp.lt.s32.totalorder %s169_s14, %s169_s14 }
   0x7   :  { %p176_p3 = por %p175_p2, %p174_p1 }
   0x9   :  { %p177_p4 = pnand %p176_p3, %p170_p0 }
   0xb   :  { %180 = shalt.err (!%p177_p4)
}
   0xc   :  { %s228_s15 = smov 128   ;;  %s229_s16 = smov 8  }
   0xd   :  { %22 = dma.hbm_to_vmem [thread:$0]  %s274_s0, 256, %s17_s13, [#allocation3], %s228_s15, %s228_s15, %s229_s16  }
   0xe   :  { %s230_s19 = smov [#allocation5]  }
   0xf   :  { %s28_s20 = sshll.u32 %s230_s19, 4  ;;  %s29_s20 = int_to_ptr.vmem [resolvable:$true] %s28_s20 }
  0x10   :  { %s189_s21 = scalar_lea.vmem %s29_s20, 256  ;;  %p194_p6 = scmp.lt.s32.totalorder %s29_s20, %s29_s20 }
  0x11   :  { %p190_p5 = scmp.ne.s32.totalorder %s29_s20, %s189_s21  ;;  %p195_p7 = scmp.lt.s32.totalorder %s189_s21, %s189_s21 }
  0x13   :  { %p196_p8 = por %p195_p7, %p194_p6 }
  0x15   :  { %p197_p9 = pnand %p196_p8, %p190_p5 }
  0x17   :  { %200 = shalt.err (!%p197_p9)
}
  0x18   :  { %s231_s22 = smov 64   ;;  %s232_s23 = smov 4  }
  0x19   :  { %34 = dma.hbm_to_vmem [thread:$0]  %s275_s1, 256, %s29_s20, [#allocation6], %s231_s22, %s231_s22, %s232_s23  }
  0x1a   :  { %221 = dma.done.wait [#allocation3], 256  }
  0x1b   :  { %222 = vsyncadd [#allocation3], 4294967040 }
  0x1c   :  { %223 = dma.done.wait [#allocation6], 256  }
  0x1d   :  { %224 = vsyncadd [#allocation6], 4294967040  ;;  %v233_v0 = vmov 0.0   ;;  %vm234_vm0 = vmmov 0   ;;  %v159_v1 = vld [vmem:[#allocation5 + $0x8] sm:$0xff]   ;;  %v160_v2 = vld [vmem:[#allocation5] sm:$0xff]  }
  0x1e   :  { %142 = vmatprep.subr.bf16.mxu0 %v233_v0  ;;  %146 = vmatprep.mubr.msk.bf16.mxu0 %vm234_vm0, %v233_v0  ;;  %v44_v3 = vld [vmem:[#allocation2] sm:$0xff]  ;;  %v45_v4 = vld [vmem:[#allocation2 + $0x8] sm:$0xff]  ;;  %vm70_vm1 = vcmask 261120   ;;  %s235_s26 = smov [#allocation7]  }
  0x1f   :  { %143 = vmatpush3.bf16.msra.mxu0 %v159_v1  ;;  %v46_v5 = vpack.c.bf16 %v45_v4, %v44_v3  ;;  %v135_v6 = vld [vmem:[%s276_s2] ss:$0 sm:$0xff]  ;;  %s122_s27 = sshll.u32 %s235_s26, 4  ;;  %s123_s27 = int_to_ptr.vmem [resolvable:$true] %s122_s27 }
  0x20   :  { %144 = vmatprep.subr.bf16.mxu0 %v233_v0  ;;  %s201_s28 = scalar_lea.vmem %s123_s27, 256  ;;  %p206_p11 = scmp.lt.s32.totalorder %s123_s27, %s123_s27 }
  0x21   :  { %p202_p10 = scmp.ne.s32.totalorder %s123_s27, %s201_s28  ;;  %p207_p12 = scmp.lt.s32.totalorder %s201_s28, %s201_s28 }
  0x23   :  { %145 = vmatpush3.bf16.msra.mxu0 %v160_v2  ;;  %p208_p13 = por %p207_p12, %p206_p11 }
  0x25   :  { %p209_p0 = pnand %p208_p13, %p202_p10 }
  0x26   :  { %147 = vmatmul.mubr.msk.bf16.vlgmr.msra.gmra.mxu0 %vm70_vm1, %v46_v5 }
  0xe6   :  { %v108_v7 = vpop.f32.mrf.mxu0 }
  0xe7   :  { %v109_v8 = vadd.f32 %v135_v6, %v108_v7 }
  0xe8   :  { %v148_v9 = vpop.f32.mrf.mxu0 }
  0xe9   :  { %115 = vst.msk [vmem:[#allocation7] sm:$0xff] %vm70_vm1, %v109_v8 }
  0xea   :  { %v111_v10 = vpop.f32.mrf.mxu0 }
  0xeb   :  { %v112_v11 = vadd.f32 %v135_v6, %v111_v10 }
  0xec   :  { %v149_v12 = vpop.f32.mrf.mxu0 }
  0xed   :  { %116 = vst.msk [vmem:[#allocation7 + $0x8] sm:$0xff] %vm70_vm1, %v112_v11 }
  0xee   :  { %212 = shalt.err (!%p209_p0)
}
  0xef   :  { %128 = dma.vmem_to_hbm [thread:$0]  %s123_s27, 256, %s277_s3, [#allocation4], %s228_s15, %s228_s15, %s229_s16  }
  0xf0   :  { %225 = dma.done.wait [#allocation4], 256  }
  0xf1   :  { %226 = vsyncadd [#allocation4], 4294967040 }
  0xf2   :  { %132 = vsyncpa [#allocation3], 1 }
  0xf3   :  { %133 = vsyncpa [#allocation6], 1 }
  0xf4   :  { %134 = vsyncpa [#allocation4], 1 }

</bundles_post_ra>
